<compile_context>
chip_gen: v6e
topology: v6e:2x2x1
jax: 0.10.0
libtpu: 0.0.40
codegen_flags: <defaults>
</compile_context>

<pallas_src>
import math

import jax
import jax.numpy as jnp
from jax.experimental import pallas as pl
from jax.experimental.pallas import tpu as pltpu


def _round_up(x, m):
    return ((x + m - 1) // m) * m


def _make_decoder_kernel(layers):
    """Fused Decoder kernel: `layers` noResBlocks (3 matmuls each) in one body.

    refs layout: (x_ref, [w1,b1,w2,b2,w3,b3] * layers, o_ref).
    `layers` is compile-time, so the block loop is a static Python unroll.
    """

    def kernel(*refs):
        x_ref = refs[0]
        o_ref = refs[-1]
        wrefs = refs[1:-1]

        h = x_ref[...]          # bf16 activation tile (TM, in_features)
        y = None
        for l in range(layers):
            w1, b1, w2, b2, w3, b3 = wrefs[6 * l:6 * l + 6]
            # bf16 operands straight into the MXU, f32 accumulation.
            a = jnp.dot(h, w1[...], preferred_element_type=jnp.float32) + b1[...]
            a = jnp.maximum(a, 0.0).astype(jnp.bfloat16)       # epilogue in f32, downcast for next MXU op
            a = jnp.dot(a, w2[...], preferred_element_type=jnp.float32) + b2[...]
            a = jnp.maximum(a, 0.0).astype(jnp.bfloat16)
            y = jnp.dot(a, w3[...], preferred_element_type=jnp.float32) + b3[...]
            if l < layers - 1:
                h = y.astype(jnp.bfloat16)

        o_ref[...] = y.astype(o_ref.dtype)                     # single lane-dense store

    return kernel


def init_decoder_params(key, input_dim, feature_dim, mid_dim, layers):
    """Deterministic init mimicking PyTorch nn.Linear default (uniform +-1/sqrt(fan_in)).

    Weights stored transposed (in_features, out_features) in bfloat16.
    Biases stored as (1, out_features) in float32 (post-accumulation add is f32).
    """
    params = []
    in_dim = feature_dim   # linearNet starts with infeature = feature_dim
    out_dim = input_dim    # outfeature = input_dim
    for _ in range(layers):
        block = []
        for fan_in, fan_out in ((in_dim, mid_dim), (mid_dim, mid_dim), (mid_dim, out_dim)):
            key, kw, kb = jax.random.split(key, 3)
            bound = 1.0 / math.sqrt(fan_in)
            w = jax.random.uniform(kw, (fan_in, fan_out), jnp.float32, -bound, bound)
            b = jax.random.uniform(kb, (1, fan_out), jnp.float32, -bound, bound)
            block.append((w.astype(jnp.bfloat16), b))
        params.append(block)
        in_dim = out_dim   # subsequent blocks: input_dim -> input_dim
    return params


def decoder_forward(x, params, *, tm=256):
    """Fused Decoder forward: one pallas_call for the whole stack of noResBlocks."""
    layers = len(params)
    B, feat = x.shape
    input_dim = params[-1][2][0].shape[1]          # last block's w3: (mid, input_dim)
    out_pad = _round_up(input_dim, 128)            # lane-dense final store

    # Batch tiling: TM multiple of 8 (MXU-sized when batch allows), pad batch to fit.
    tm_eff = min(tm, _round_up(B, 8))
    b_pad = _round_up(B, tm_eff)
    n_m = b_pad // tm_eff

    x_bf = x.astype(jnp.bfloat16)
    if b_pad != B:
        x_bf = jnp.pad(x_bf, ((0, b_pad - B), (0, 0)))

    # Flatten weights; pad the FINAL Linear's columns to out_pad with zeros.
    flat = []
    for li, ((w1, b1), (w2, b2), (w3, b3)) in enumerate(params):
        if li == layers - 1 and out_pad != input_dim:
            w3 = jnp.pad(w3, ((0, 0), (0, out_pad - input_dim)))
            b3 = jnp.pad(b3, ((0, 0), (0, out_pad - input_dim)))
        flat += [w1, b1, w2, b2, w3, b3]

    def _resident(a):
        # Whole array every grid step -> DMA'd once, stays resident in VMEM.
        return pl.BlockSpec(a.shape, lambda i: (0, 0))

    in_specs = [pl.BlockSpec((tm_eff, feat), lambda i: (i, 0))] + [_resident(a) for a in flat]

    out = pl.pallas_call(
        _make_decoder_kernel(layers),
        out_shape=jax.ShapeDtypeStruct((b_pad, out_pad), jnp.float32),
        grid=(n_m,),
        in_specs=in_specs,
        out_specs=pl.BlockSpec((tm_eff, out_pad), lambda i: (i, 0)),
        compiler_params=pltpu.CompilerParams(dimension_semantics=("parallel",)),
    )(x_bf, *flat)

    return out[:B, :input_dim]


def decoder_forward_ref(x, params):
    """Pure-JAX reference mirroring the kernel's bf16/f32 numerics."""
    h = x.astype(jnp.bfloat16)
    y = None
    for (w1, b1), (w2, b2), (w3, b3) in params:
        a = jnp.maximum(jnp.dot(h, w1, preferred_element_type=jnp.float32) + b1, 0.0)
        a = a.astype(jnp.bfloat16)
        a = jnp.maximum(jnp.dot(a, w2, preferred_element_type=jnp.float32) + b2, 0.0)
        a = a.astype(jnp.bfloat16)
        y = jnp.dot(a, w3, preferred_element_type=jnp.float32) + b3
        h = y.astype(jnp.bfloat16)
    return y


if __name__ == "__main__":
    # Small shapes consistent with the module's forward.
    batch = 8
    input_dim = 64     # Decoder output width
    feature_dim = 32   # Decoder input width (latent features)
    mid_dim = 128
    layers = 2

    key = jax.random.PRNGKey(0)
    key, kx = jax.random.split(key)
    x = jax.random.normal(kx, (batch, feature_dim), jnp.float32)

    params = init_decoder_params(key, input_dim, feature_dim, mid_dim, layers)

    y = jax.block_until_ready(decoder_forward(x, params))
    y_ref = decoder_forward_ref(x, params)

    assert y.shape == (batch, input_dim)
    assert jnp.allclose(y, y_ref, atol=1e-2, rtol=1e-2), "mismatch vs reference"

    print("KERNEL_OK")
</pallas_src>

<mosaic_0001>
module attributes {stable_mosaic.version = 11 : i64} {
  func.func @kernel(%arg0: i32, %arg1: memref<8x32xbf16, #tpu.memory_space<vmem>>, %arg2: memref<32x128xbf16, #tpu.memory_space<vmem>>, %arg3: memref<1x128xf32, #tpu.memory_space<vmem>>, %arg4: memref<128x128xbf16, #tpu.memory_space<vmem>>, %arg5: memref<1x128xf32, #tpu.memory_space<vmem>>, %arg6: memref<128x64xbf16, #tpu.memory_space<vmem>>, %arg7: memref<1x64xf32, #tpu.memory_space<vmem>>, %arg8: memref<64x128xbf16, #tpu.memory_space<vmem>>, %arg9: memref<1x128xf32, #tpu.memory_space<vmem>>, %arg10: memref<128x128xbf16, #tpu.memory_space<vmem>>, %arg11: memref<1x128xf32, #tpu.memory_space<vmem>>, %arg12: memref<128x128xbf16, #tpu.memory_space<vmem>>, %arg13: memref<1x128xf32, #tpu.memory_space<vmem>>, %arg14: memref<8x128xf32, #tpu.memory_space<vmem>>) attributes {dimension_semantics = [#tpu.dimension_semantics<parallel>], iteration_bounds = array<i64: 1>, scalar_prefetch = 0 : i64, scratch_operands = 0 : i64, tpu.core_type = #tpu.core_type<tc>, window_params = [{transform_indices = @transform_0, window_bounds = array<i64: 8, 32>}, {pipeline_mode = #tpu.pipeline_mode<synchronous>, transform_indices = @transform_1, window_bounds = array<i64: 32, 128>}, {pipeline_mode = #tpu.pipeline_mode<synchronous>, transform_indices = @transform_2, window_bounds = array<i64: 1, 128>}, {pipeline_mode = #tpu.pipeline_mode<synchronous>, transform_indices = @transform_3, window_bounds = array<i64: 128, 128>}, {pipeline_mode = #tpu.pipeline_mode<synchronous>, transform_indices = @transform_4, window_bounds = array<i64: 1, 128>}, {pipeline_mode = #tpu.pipeline_mode<synchronous>, transform_indices = @transform_5, window_bounds = array<i64: 128, 64>}, {pipeline_mode = #tpu.pipeline_mode<synchronous>, transform_indices = @transform_6, window_bounds = array<i64: 1, 64>}, {pipeline_mode = #tpu.pipeline_mode<synchronous>, transform_indices = @transform_7, window_bounds = array<i64: 64, 128>}, {pipeline_mode = #tpu.pipeline_mode<synchronous>, transform_indices = @transform_8, window_bounds = array<i64: 1, 128>}, {pipeline_mode = #tpu.pipeline_mode<synchronous>, transform_indices = @transform_9, window_bounds = array<i64: 128, 128>}, {pipeline_mode = #tpu.pipeline_mode<synchronous>, transform_indices = @transform_10, window_bounds = array<i64: 1, 128>}, {pipeline_mode = #tpu.pipeline_mode<synchronous>, transform_indices = @transform_11, window_bounds = array<i64: 128, 128>}, {pipeline_mode = #tpu.pipeline_mode<synchronous>, transform_indices = @transform_12, window_bounds = array<i64: 1, 128>}, {transform_indices = @transform_13, window_bounds = array<i64: 8, 128>}]} {
    %c0 = arith.constant 0 : index
    %c0_0 = arith.constant 0 : index
    %0 = vector.load %arg1[%c0, %c0_0] : memref<8x32xbf16, #tpu.memory_space<vmem>>, vector<8x32xbf16>
    %c0_1 = arith.constant 0 : index
    %c0_2 = arith.constant 0 : index
    %1 = vector.load %arg2[%c0_1, %c0_2] : memref<32x128xbf16, #tpu.memory_space<vmem>>, vector<32x128xbf16>
    %cst = arith.constant dense<0.000000e+00> : vector<8x128xf32>
    %2 = tpu.matmul %0, %1, %cst {dimension_numbers = #tpu.dot_dimension_numbers<[1], [0], [0], [1], [0, 0, 1, 1], [], []>} : vector<8x32xbf16>, vector<32x128xbf16>, vector<8x128xf32> -> vector<8x128xf32>
    %c0_3 = arith.constant 0 : index
    %c0_4 = arith.constant 0 : index
    %3 = vector.load %arg3[%c0_3, %c0_4] : memref<1x128xf32, #tpu.memory_space<vmem>>, vector<1x128xf32>
    %4 = vector.broadcast %3 : vector<1x128xf32> to vector<8x128xf32>
    %5 = arith.addf %2, %4 : vector<8x128xf32>
    %cst_5 = arith.constant 0.000000e+00 : f32
    %6 = vector.broadcast %cst_5 : f32 to vector<8x128xf32>
    %7 = arith.maximumf %5, %6 : vector<8x128xf32>
    %8 = arith.truncf %7 : vector<8x128xf32> to vector<8x128xbf16>
    %c0_6 = arith.constant 0 : index
    %c0_7 = arith.constant 0 : index
    %9 = vector.load %arg4[%c0_6, %c0_7] : memref<128x128xbf16, #tpu.memory_space<vmem>>, vector<128x128xbf16>
    %cst_8 = arith.constant dense<0.000000e+00> : vector<8x128xf32>
    %10 = tpu.matmul %8, %9, %cst_8 {dimension_numbers = #tpu.dot_dimension_numbers<[1], [0], [0], [1], [0, 0, 1, 1], [], []>} : vector<8x128xbf16>, vector<128x128xbf16>, vector<8x128xf32> -> vector<8x128xf32>
    %c0_9 = arith.constant 0 : index
    %c0_10 = arith.constant 0 : index
    %11 = vector.load %arg5[%c0_9, %c0_10] : memref<1x128xf32, #tpu.memory_space<vmem>>, vector<1x128xf32>
    %12 = vector.broadcast %11 : vector<1x128xf32> to vector<8x128xf32>
    %13 = arith.addf %10, %12 : vector<8x128xf32>
    %cst_11 = arith.constant 0.000000e+00 : f32
    %14 = vector.broadcast %cst_11 : f32 to vector<8x128xf32>
    %15 = arith.maximumf %13, %14 : vector<8x128xf32>
    %16 = arith.truncf %15 : vector<8x128xf32> to vector<8x128xbf16>
    %c0_12 = arith.constant 0 : index
    %c0_13 = arith.constant 0 : index
    %17 = vector.load %arg6[%c0_12, %c0_13] : memref<128x64xbf16, #tpu.memory_space<vmem>>, vector<128x64xbf16>
    %cst_14 = arith.constant dense<0.000000e+00> : vector<8x64xf32>
    %18 = tpu.matmul %16, %17, %cst_14 {dimension_numbers = #tpu.dot_dimension_numbers<[1], [0], [0], [1], [0, 0, 1, 1], [], []>} : vector<8x128xbf16>, vector<128x64xbf16>, vector<8x64xf32> -> vector<8x64xf32>
    %c0_15 = arith.constant 0 : index
    %c0_16 = arith.constant 0 : index
    %19 = vector.load %arg7[%c0_15, %c0_16] : memref<1x64xf32, #tpu.memory_space<vmem>>, vector<1x64xf32>
    %20 = vector.broadcast %19 : vector<1x64xf32> to vector<8x64xf32>
    %21 = arith.addf %18, %20 : vector<8x64xf32>
    %22 = arith.truncf %21 : vector<8x64xf32> to vector<8x64xbf16>
    %c0_17 = arith.constant 0 : index
    %c0_18 = arith.constant 0 : index
    %23 = vector.load %arg8[%c0_17, %c0_18] : memref<64x128xbf16, #tpu.memory_space<vmem>>, vector<64x128xbf16>
    %cst_19 = arith.constant dense<0.000000e+00> : vector<8x128xf32>
    %24 = tpu.matmul %22, %23, %cst_19 {dimension_numbers = #tpu.dot_dimension_numbers<[1], [0], [0], [1], [0, 0, 1, 1], [], []>} : vector<8x64xbf16>, vector<64x128xbf16>, vector<8x128xf32> -> vector<8x128xf32>
    %c0_20 = arith.constant 0 : index
    %c0_21 = arith.constant 0 : index
    %25 = vector.load %arg9[%c0_20, %c0_21] : memref<1x128xf32, #tpu.memory_space<vmem>>, vector<1x128xf32>
    %26 = vector.broadcast %25 : vector<1x128xf32> to vector<8x128xf32>
    %27 = arith.addf %24, %26 : vector<8x128xf32>
    %cst_22 = arith.constant 0.000000e+00 : f32
    %28 = vector.broadcast %cst_22 : f32 to vector<8x128xf32>
    %29 = arith.maximumf %27, %28 : vector<8x128xf32>
    %30 = arith.truncf %29 : vector<8x128xf32> to vector<8x128xbf16>
    %c0_23 = arith.constant 0 : index
    %c0_24 = arith.constant 0 : index
    %31 = vector.load %arg10[%c0_23, %c0_24] : memref<128x128xbf16, #tpu.memory_space<vmem>>, vector<128x128xbf16>
    %cst_25 = arith.constant dense<0.000000e+00> : vector<8x128xf32>
    %32 = tpu.matmul %30, %31, %cst_25 {dimension_numbers = #tpu.dot_dimension_numbers<[1], [0], [0], [1], [0, 0, 1, 1], [], []>} : vector<8x128xbf16>, vector<128x128xbf16>, vector<8x128xf32> -> vector<8x128xf32>
    %c0_26 = arith.constant 0 : index
    %c0_27 = arith.constant 0 : index
    %33 = vector.load %arg11[%c0_26, %c0_27] : memref<1x128xf32, #tpu.memory_space<vmem>>, vector<1x128xf32>
    %34 = vector.broadcast %33 : vector<1x128xf32> to vector<8x128xf32>
    %35 = arith.addf %32, %34 : vector<8x128xf32>
    %cst_28 = arith.constant 0.000000e+00 : f32
    %36 = vector.broadcast %cst_28 : f32 to vector<8x128xf32>
    %37 = arith.maximumf %35, %36 : vector<8x128xf32>
    %38 = arith.truncf %37 : vector<8x128xf32> to vector<8x128xbf16>
    %c0_29 = arith.constant 0 : index
    %c0_30 = arith.constant 0 : index
    %39 = vector.load %arg12[%c0_29, %c0_30] : memref<128x128xbf16, #tpu.memory_space<vmem>>, vector<128x128xbf16>
    %cst_31 = arith.constant dense<0.000000e+00> : vector<8x128xf32>
    %40 = tpu.matmul %38, %39, %cst_31 {dimension_numbers = #tpu.dot_dimension_numbers<[1], [0], [0], [1], [0, 0, 1, 1], [], []>} : vector<8x128xbf16>, vector<128x128xbf16>, vector<8x128xf32> -> vector<8x128xf32>
    %c0_32 = arith.constant 0 : index
    %c0_33 = arith.constant 0 : index
    %41 = vector.load %arg13[%c0_32, %c0_33] : memref<1x128xf32, #tpu.memory_space<vmem>>, vector<1x128xf32>
    %42 = vector.broadcast %41 : vector<1x128xf32> to vector<8x128xf32>
    %43 = arith.addf %40, %42 : vector<8x128xf32>
    %c0_34 = arith.constant 0 : index
    %c0_35 = arith.constant 0 : index
    %44 = vector.load %arg14[%c0_34, %c0_35] : memref<8x128xf32, #tpu.memory_space<vmem>>, vector<8x128xf32>
    tpu.vector_store %arg14[%c0_34, %c0_35], %43 {strides = array<i32>} : memref<8x128xf32, #tpu.memory_space<vmem>>, vector<8x128xf32>,
    return
  }
  func.func @transform_0(%arg0: i32) -> (i32, i32) {
    %c0_i32 = arith.constant 0 : i32
    %c0_i32_0 = arith.constant 0 : i32
    return %arg0, %c0_i32 : i32, i32
  }
  func.func @transform_1(%arg0: i32) -> (i32, i32) {
    %c0_i32 = arith.constant 0 : i32
    %c0_i32_0 = arith.constant 0 : i32
    %c0_i32_1 = arith.constant 0 : i32
    return %c0_i32, %c0_i32_0 : i32, i32
  }
  func.func @transform_2(%arg0: i32) -> (i32, i32) {
    %c0_i32 = arith.constant 0 : i32
    %c0_i32_0 = arith.constant 0 : i32
    %c0_i32_1 = arith.constant 0 : i32
    return %c0_i32, %c0_i32_0 : i32, i32
  }
  func.func @transform_3(%arg0: i32) -> (i32, i32) {
    %c0_i32 = arith.constant 0 : i32
    %c0_i32_0 = arith.constant 0 : i32
    %c0_i32_1 = arith.constant 0 : i32
    return %c0_i32, %c0_i32_0 : i32, i32
  }
  func.func @transform_4(%arg0: i32) -> (i32, i32) {
    %c0_i32 = arith.constant 0 : i32
    %c0_i32_0 = arith.constant 0 : i32
    %c0_i32_1 = arith.constant 0 : i32
    return %c0_i32, %c0_i32_0 : i32, i32
  }
  func.func @transform_5(%arg0: i32) -> (i32, i32) {
    %c0_i32 = arith.constant 0 : i32
    %c0_i32_0 = arith.constant 0 : i32
    %c0_i32_1 = arith.constant 0 : i32
    return %c0_i32, %c0_i32_0 : i32, i32
  }
  func.func @transform_6(%arg0: i32) -> (i32, i32) {
    %c0_i32 = arith.constant 0 : i32
    %c0_i32_0 = arith.constant 0 : i32
    %c0_i32_1 = arith.constant 0 : i32
    return %c0_i32, %c0_i32_0 : i32, i32
  }
  func.func @transform_7(%arg0: i32) -> (i32, i32) {
    %c0_i32 = arith.constant 0 : i32
    %c0_i32_0 = arith.constant 0 : i32
    %c0_i32_1 = arith.constant 0 : i32
    return %c0_i32, %c0_i32_0 : i32, i32
  }
  func.func @transform_8(%arg0: i32) -> (i32, i32) {
    %c0_i32 = arith.constant 0 : i32
    %c0_i32_0 = arith.constant 0 : i32
    %c0_i32_1 = arith.constant 0 : i32
    return %c0_i32, %c0_i32_0 : i32, i32
  }
  func.func @transform_9(%arg0: i32) -> (i32, i32) {
    %c0_i32 = arith.constant 0 : i32
    %c0_i32_0 = arith.constant 0 : i32
    %c0_i32_1 = arith.constant 0 : i32
    return %c0_i32, %c0_i32_0 : i32, i32
  }
  func.func @transform_10(%arg0: i32) -> (i32, i32) {
    %c0_i32 = arith.constant 0 : i32
    %c0_i32_0 = arith.constant 0 : i32
    %c0_i32_1 = arith.constant 0 : i32
    return %c0_i32, %c0_i32_0 : i32, i32
  }
  func.func @transform_11(%arg0: i32) -> (i32, i32) {
    %c0_i32 = arith.constant 0 : i32
    %c0_i32_0 = arith.constant 0 : i32
    %c0_i32_1 = arith.constant 0 : i32
    return %c0_i32, %c0_i32_0 : i32, i32
  }
  func.func @transform_12(%arg0: i32) -> (i32, i32) {
    %c0_i32 = arith.constant 0 : i32
    %c0_i32_0 = arith.constant 0 : i32
    %c0_i32_1 = arith.constant 0 : i32
    return %c0_i32, %c0_i32_0 : i32, i32
  }
  func.func @transform_13(%arg0: i32) -> (i32, i32) {
    %c0_i32 = arith.constant 0 : i32
    %c0_i32_0 = arith.constant 0 : i32
    return %arg0, %c0_i32 : i32, i32
  }
}

</mosaic_0001>

<bundles_post_ra>
// kernel: tpu_custom_call.1
= control target key start
LH: loop header
LB: loop body
LE: loop exit
PB: predicated region body
PF: predicated region fallthrough
CT: control target
= control target key end

     0   :  { %18 = vsyncpa [#allocation3], 0  ;;  %s1251_s0 = inlined_call_operand.vmem [shape: bf16[8,32], index: 0, kind: input, shape index: {}]   ;;  %s1252_s1 = inlined_call_operand.hbm [shape: bf16[32,128], index: 1, kind: input, shape index: {}]   ;;  %s1253_s2 = inlined_call_operand.vmem [shape: f32[1,128], index: 2, kind: input, shape index: {}]   ;;  %s1254_s3 = inlined_call_operand.vmem [shape: bf16[128,128], index: 3, kind: input, shape index: {}]   ;;  %s1255_s4 = inlined_call_operand.vmem [shape: f32[1,128], index: 4, kind: input, shape index: {}]   ;;  %s1256_s5 = inlined_call_operand.vmem [shape: bf16[128,64], index: 5, kind: input, shape index: {}]   ;;  %s1257_s6 = inlined_call_operand.vmem [shape: f32[1,64], index: 6, kind: input, shape index: {}]   ;;  %s1258_s7 = inlined_call_operand.vmem [shape: bf16[64,128], index: 7, kind: input, shape index: {}]   ;;  %s1259_s8 = inlined_call_operand.vmem [shape: f32[1,128], index: 8, kind: input, shape index: {}]   ;;  %s1260_s9 = inlined_call_operand.hbm [shape: bf16[128,128], index: 9, kind: input, shape index: {}]   ;;  %s1261_s10 = inlined_call_operand.vmem [shape: f32[1,128], index: 10, kind: input, shape index: {}]   ;;  %s1262_s11 = inlined_call_operand.hbm [shape: bf16[128,128], index: 11, kind: input, shape index: {}]   ;;  %s1263_s12 = inlined_call_operand.vmem [shape: f32[1,128], index: 12, kind: input, shape index: {}]   ;;  %s1264_s13 = inlined_call_operand.hbm [shape: f32[8,128], index: 13, kind: output, shape index: {}]  }
   0x1   :  { %19 = vsyncpa [#allocation6], 0 }
   0x2   :  { %20 = vsyncpa [#allocation4], 0  ;;  %s1030_s25 = smov [#allocation5]   ;;  %s1031_s27 = smov [#allocation2]  }
   0x3   :  { %s54_s26 = sshll.u32 %s1030_s25, 4  ;;  %s28_s28 = sshll.u32 %s1031_s27, 4  ;;  %s55_s26 = int_to_ptr.vmem [resolvable:$true] %s54_s26  ;;  %s29_s28 = int_to_ptr.vmem [resolvable:$true] %s28_s28 }
   0x4   :  { %s952_s29 = scalar_lea.vmem %s55_s26, 1024  ;;  %p957_p1 = scmp.lt.s32.totalorder %s55_s26, %s55_s26 }
   0x5   :  { %p953_p0 = scmp.ne.s32.totalorder %s55_s26, %s952_s29  ;;  %p958_p2 = scmp.lt.s32.totalorder %s952_s29, %s952_s29 }
   0x7   :  { %p959_p3 = por %p958_p2, %p957_p1 }
   0x9   :  { %p960_p4 = pnand %p959_p3, %p953_p0 }
   0xb   :  { %963 = shalt.err (!%p960_p4)
}
   0xc   :  { %s1032_s30 = smov 64   ;;  %s1033_s14 = smov 4  }
   0xd   :  { %60 = dma.hbm_to_vmem [thread:$0]  %s1260_s9, 1024, %s55_s26, [#allocation6], %s1032_s30, %s1032_s30, %s1033_s14  }
   0xe   :  { %s972_s17 = scalar_lea.vmem %s29_s28, 256  ;;  %p977_p6 = scmp.lt.s32.totalorder %s29_s28, %s29_s28 }
   0xf   :  { %p973_p5 = scmp.ne.s32.totalorder %s29_s28, %s972_s17  ;;  %p978_p7 = scmp.lt.s32.totalorder %s972_s17, %s972_s17 }
  0x11   :  { %p979_p8 = por %p978_p7, %p977_p6 }
  0x13   :  { %p980_p9 = pnand %p979_p8, %p973_p5 }
  0x15   :  { %983 = shalt.err (!%p980_p9)
}
  0x16   :  { %34 = dma.hbm_to_vmem [thread:$0]  %s1252_s1, 256, %s29_s28, [#allocation3], %s1032_s30, %s1032_s30, %s1033_s14  }
  0x17   :  { %s1034_s20 = smov [#allocation7]  }
  0x18   :  { %s68_s21 = sshll.u32 %s1034_s20, 4  ;;  %s69_s21 = int_to_ptr.vmem [resolvable:$true] %s68_s21 }
  0x19   :  { %s992_s22 = scalar_lea.vmem %s69_s21, 1024  ;;  %p997_p11 = scmp.lt.s32.totalorder %s69_s21, %s69_s21 }
  0x1a   :  { %p993_p10 = scmp.ne.s32.totalorder %s69_s21, %s992_s22  ;;  %p998_p12 = scmp.lt.s32.totalorder %s992_s22, %s992_s22 }
  0x1c   :  { %p999_p13 = por %p998_p12, %p997_p11 }
  0x1e   :  { %p1000_p0 = pnand %p999_p13, %p993_p10 }
  0x20   :  { %1003 = shalt.err (!%p1000_p0)
}
  0x21   :  { %74 = dma.hbm_to_vmem [thread:$0]  %s1262_s11, 1024, %s69_s21, [#allocation6], %s1032_s30, %s1032_s30, %s1033_s14  }
  0x22   :  { %1024 = dma.done.wait [#allocation3], 256  }
  0x23   :  { %1025 = vsyncadd [#allocation3], 4294967040 }
  0x24   :  { %1026 = dma.done.wait [#allocation6], 2048  }
  0x25   :  { %1027 = vsyncadd [#allocation6], 4294965248  ;;  %v1035_v0 = vmov 0.0   ;;  %vm1036_vm0 = vmmov 0   ;;  %v906_v1 = vld [vmem:[#allocation2 + $0x8] sm:$0xff]   ;;  %v907_v2 = vld [vmem:[#allocation2] sm:$0xff]  }
  0x26   :  { %798 = vmatprep.subr.bf16.mxu0 %v1035_v0  ;;  %802 = vmatprep.mubr.msk.bf16.mxu0 %vm1036_vm0, %v1035_v0  ;;  %v908_v3 = vld [vmem:[%s1254_s3 + $0x38] sm:$0xff]   ;;  %vm111_vm1 = vcmask 261120   ;;  %v909_v4 = vld [vmem:[%s1254_s3 + $0x30] sm:$0xff]   ;;  %v87_v5 = vld [vmem:[%s1251_s0] sm:$0xf]  ;;  %vm421_vm2 = vcmask 523264  }
  0x27   :  { %806 = vmatprep.subr.bf16.mxu1 %v1035_v0  ;;  %822 = vmatprep.mubr.msk.bf16.mxu1 %vm1036_vm0, %v1035_v0  ;;  %v910_v6 = vld [vmem:[%s1254_s3 + $0x28] sm:$0xff]   ;;  %v911_v7 = vld [vmem:[%s1254_s3 + $0x20] sm:$0xff]   ;;  %v912_v8 = vld [vmem:[%s1254_s3 + $0x18] sm:$0xff]   ;;  %s1037_s26 = smov [#allocation8]  }
  0x28   :  { %799 = vmatpush3.bf16.msra.mxu0 %v906_v1  ;;  %807 = vmatpush3.bf16.msra.mxu1 %v908_v3  ;;  %v913_v9 = vld [vmem:[%s1254_s3 + $0x10] sm:$0xff]   ;;  %v914_v10 = vld [vmem:[%s1254_s3 + $0x8] sm:$0xff]   ;;  %v915_v11 = vld [vmem:[%s1254_s3] sm:$0xff]   ;;  %s698_s27 = sshll.u32 %s1037_s26, 4  ;;  %s699_s27 = int_to_ptr.vmem [resolvable:$true] %s698_s27 }
  0x29   :  { %800 = vmatprep.subr.bf16.mxu0 %v1035_v0  ;;  %808 = vmatprep.subr.bf16.mxu1 %v1035_v0  ;;  %v916_v12 = vld [vmem:[%s1256_s5 + $0x38] sm:$0xff]   ;;  %v917_v13 = vld [vmem:[%s1256_s5 + $0x30] sm:$0xff]   ;;  %v918_v14 = vld [vmem:[%s1256_s5 + $0x28] sm:$0xff]   ;;  %p1009_p2 = scmp.lt.s32.totalorder %s699_s27, %s699_s27 }
  0x2a   :  { %v919_v15 = vld [vmem:[%s1256_s5 + $0x20] sm:$0xff]   ;;  %v920_v16 = vld [vmem:[%s1256_s5 + $0x18] sm:$0xff]   ;;  %v921_v17 = vld [vmem:[%s1256_s5 + $0x10] sm:$0xff]  }
  0x2b   :  { %v708_v18 = vld [vmem:[%s1253_s2] ss:$0 sm:$0xff]  ;;  %v922_v26 = vld [vmem:[%s1256_s5 + $0x8] sm:$0xff]   ;;  %v924_v28 = vld [vmem:[%s1258_s7 + $0x18] sm:$0xff]  }
  0x2c   :  { %801 = vmatpush3.bf16.msra.mxu0 %v907_v2  ;;  %809 = vmatpush3.bf16.msra.mxu1 %v909_v4  ;;  %v923_v27 = vld [vmem:[%s1256_s5] sm:$0xff]   ;;  %v925_v29 = vld [vmem:[%s1258_s7 + $0x10] sm:$0xff]   ;;  %v926_v30 = vld [vmem:[%s1258_s7 + $0x8] sm:$0xff]  }
  0x2d   :  { %826 = vmatprep.subr.bf16.mxu0 %v1035_v0  ;;  %810 = vmatprep.subr.bf16.mxu1 %v1035_v0  ;;  %v712_v31 = vld [vmem:[%s1255_s4] ss:$0 sm:$0xff]  ;;  %v928_v40 = vld [vmem:[#allocation5 + $0x38] sm:$0xff]   ;;  %v930_v42 = vld [vmem:[#allocation5 + $0x28] sm:$0xff]  }
  0x2e   :  { %v927_v39 = vld [vmem:[%s1258_s7] sm:$0xff]   ;;  %v931_v43 = vld [vmem:[#allocation5 + $0x20] sm:$0xff]   ;;  %v932_v44 = vld [vmem:[#allocation5 + $0x18] sm:$0xff]  }
  0x2f   :  { %803 = vmatmul.mubr.msk.bf16.vlgmr.msra.gmra.mxu0 %vm111_vm1, %v87_v5  ;;  %v929_v41 = vld [vmem:[#allocation5 + $0x30] sm:$0xff]   ;;  %v934_v53 = vld [vmem:[#allocation5 + $0x8] sm:$0xff]   ;;  %v935_v54 = vld [vmem:[#allocation5] sm:$0xff]  }
  0x30   :  { %842 = vmatprep.mubr.msk.bf16.mxu0 %vm1036_vm0, %v1035_v0  ;;  %811 = vmatpush3.bf16.msra.mxu1 %v910_v6  ;;  %v933_v45 = vld [vmem:[#allocation5 + $0x10] sm:$0xff]   ;;  %v936_v55 = vld [vmem:[#allocation7 + $0x38] sm:$0xff]   ;;  %v938_v57 = vld [vmem:[#allocation7 + $0x28] sm:$0xff]  }
  0x31   :  { %812 = vmatprep.subr.bf16.mxu1 %v1035_v0  ;;  %827 = vmatpush3.bf16.msra.mxu0 %v916_v12  ;;  %v721_v46 = vld [vmem:[%s1257_s6] ss:$0 sm:$0xff]  ;;  %v939_v58 = vld [vmem:[#allocation7 + $0x20] sm:$0xff]   ;;  %v940_v59 = vld [vmem:[#allocation7 + $0x18] sm:$0xff]  }
  0x32   :  { %828 = vmatprep.subr.bf16.mxu0 %v1035_v0  ;;  %v937_v56 = vld [vmem:[#allocation7 + $0x30] sm:$0xff]   ;;  %v942_v6 = vld [vmem:[#allocation7 + $0x8] sm:$0xff]  }
  0x33   :  { %v941_v60 = vld [vmem:[#allocation7 + $0x10] sm:$0xff]  }
  0x34   :  { %813 = vmatpush3.bf16.msra.mxu1 %v911_v7  ;;  %v730_v61 = vld [vmem:[%s1259_s8] ss:$0 sm:$0xff]  ;;  %v943_v7 = vld [vmem:[#allocation7] sm:$0xff]  }
  0x35   :  { %814 = vmatprep.subr.bf16.mxu1 %v1035_v0  ;;  %829 = vmatpush3.bf16.msra.mxu0 %v917_v13 }
  0x36   :  { %830 = vmatprep.subr.bf16.mxu0 %v1035_v0 }
  0x38   :  { %815 = vmatpush3.bf16.msra.mxu1 %v912_v8  ;;  %v736_v8 = vld [vmem:[%s1261_s10] ss:$0 sm:$0xff]  ;;  %s1004_s10 = scalar_lea.vmem %s699_s27, 128 }
  0x39   :  { %816 = vmatprep.subr.bf16.mxu1 %v1035_v0  ;;  %831 = vmatpush3.bf16.msra.mxu0 %v918_v14  ;;  %p1005_p1 = scmp.ne.s32.totalorder %s699_s27, %s1004_s10  ;;  %p1010_p3 = scmp.lt.s32.totalorder %s1004_s10, %s1004_s10 }
  0x3a   :  { %832 = vmatprep.subr.bf16.mxu0 %v1035_v0 }
  0x3b   :  { %p1011_p4 = por %p1010_p3, %p1009_p2 }
  0x3c   :  { %817 = vmatpush3.bf16.msra.mxu1 %v913_v9 }
  0x3d   :  { %818 = vmatprep.subr.bf16.mxu1 %v1035_v0  ;;  %833 = vmatpush3.bf16.msra.mxu0 %v919_v15  ;;  %p1012_p5 = pnand %p1011_p4, %p1005_p1 }
  0x3e   :  { %834 = vmatprep.subr.bf16.mxu0 %v1035_v0 }
  0x40   :  { %819 = vmatpush3.bf16.msra.mxu1 %v914_v10 }
  0x41   :  { %820 = vmatprep.subr.bf16.mxu1 %v1035_v0  ;;  %835 = vmatpush3.bf16.msra.mxu0 %v920_v16  ;;  %v745_v16 = vld [vmem:[%s1263_s12] ss:$0 sm:$0xff] }
  0x42   :  { %836 = vmatprep.subr.bf16.mxu0 %v1035_v0 }
  0x44   :  { %821 = vmatpush3.bf16.msra.mxu1 %v915_v11 }
  0x45   :  { %846 = vmatprep.subr.bf16.mxu1 %v1035_v0  ;;  %837 = vmatpush3.bf16.msra.mxu0 %v921_v17 }
  0x46   :  { %838 = vmatprep.subr.bf16.mxu0 %v1035_v0 }
  0x49   :  { %839 = vmatpush3.bf16.msra.mxu0 %v922_v26 }
  0x4a   :  { %840 = vmatprep.subr.bf16.mxu0 %v1035_v0 }
  0x4d   :  { %841 = vmatpush3.bf16.msra.mxu0 %v923_v27 }
  0x4e   :  { %858 = vmatprep.subr.bf16.mxu0 %v1035_v0 }
  0xef   :  { %v149_v19 = vpop.f32.mrf.mxu0 }
  0xf0   :  { %v150_v20 = vadd.f32 %v708_v18, %v149_v19 }
  0xf1   :  { %v804_v21 = vpop.f32.mrf.mxu0 }
  0xf2   :  { %v155_v22 = vmax.f32 %v150_v20, 0.0 }
  0xf3   :  { %v152_v23 = vpop.f32.mrf.mxu0 }
  0xf4   :  { %v156_v24 = vpack.c.bf16 %v155_v22, %v155_v22 }
  0xf5   :  { %v805_v25 = vpop.f32.mrf.mxu0 }
  0xf6   :  { %823 = vmatmul.mubr.bf16.vlgmr.msra.gmra.mxu1 %v156_v24 }
  0xf7   :  { %854 = vmatprep.mubr.msk.bf16.mxu1 %vm1036_vm0, %v1035_v0  ;;  %847 = vmatpush3.bf16.msra.mxu1 %v924_v28 }
  0xf8   :  { %848 = vmatprep.subr.bf16.mxu1 %v1035_v0 }
  0xfb   :  { %849 = vmatpush3.bf16.msra.mxu1 %v925_v29 }
  0xfc   :  { %850 = vmatprep.subr.bf16.mxu1 %v1035_v0 }
  0xff   :  { %851 = vmatpush3.bf16.msra.mxu1 %v926_v30 }
 0x100   :  { %852 = vmatprep.subr.bf16.mxu1 %v1035_v0 }
 0x103   :  { %853 = vmatpush3.bf16.msra.mxu1 %v927_v39 }
 0x104   :  { %878 = vmatprep.subr.bf16.mxu1 %v1035_v0 }
 0x1b6   :  { %v262_v32 = vpop.f32.mrf.mxu1 }
 0x1b7   :  { %v263_v33 = vadd.f32 %v712_v31, %v262_v32 }
 0x1b8   :  { %v824_v34 = vpop.f32.mrf.mxu1 }
 0x1b9   :  { %v268_v35 = vmax.f32 %v263_v33, 0.0 }
 0x1ba   :  { %v265_v36 = vpop.f32.mrf.mxu1 }
 0x1bb   :  { %v269_v37 = vpack.c.bf16 %v268_v35, %v268_v35 }
 0x1bc   :  { %v825_v38 = vpop.f32.mrf.mxu1 }
 0x1bd   :  { %843 = vmatmul.mubr.bf16.vlgmr.msra.gmra.mxu0 %v269_v37 }
 0x1be   :  { %874 = vmatprep.mubr.msk.bf16.mxu0 %vm1036_vm0, %v1035_v0  ;;  %859 = vmatpush3.bf16.msra.mxu0 %v928_v40 }
 0x1bf   :  { %860 = vmatprep.subr.bf16.mxu0 %v1035_v0 }
 0x1c2   :  { %861 = vmatpush3.bf16.msra.mxu0 %v929_v41 }
 0x1c3   :  { %862 = vmatprep.subr.bf16.mxu0 %v1035_v0 }
 0x1c6   :  { %863 = vmatpush3.bf16.msra.mxu0 %v930_v42 }
 0x1c7   :  { %864 = vmatprep.subr.bf16.mxu0 %v1035_v0 }
 0x1ca   :  { %865 = vmatpush3.bf16.msra.mxu0 %v931_v43 }
 0x1cb   :  { %866 = vmatprep.subr.bf16.mxu0 %v1035_v0 }
 0x1ce   :  { %867 = vmatpush3.bf16.msra.mxu0 %v932_v44 }
 0x1cf   :  { %868 = vmatprep.subr.bf16.mxu0 %v1035_v0 }
 0x1d2   :  { %869 = vmatpush3.bf16.msra.mxu0 %v933_v45 }
 0x1d3   :  { %870 = vmatprep.subr.bf16.mxu0 %v1035_v0 }
 0x1d6   :  { %871 = vmatpush3.bf16.msra.mxu0 %v934_v53 }
 0x1d7   :  { %872 = vmatprep.subr.bf16.mxu0 %v1035_v0 }
 0x1da   :  { %873 = vmatpush3.bf16.msra.mxu0 %v935_v54 }
 0x27d   :  { %v375_v47 = vpop.f32.mrf.mxu0 }
 0x27e   :  { %v376_v48 = vadd.f32 %v721_v46, %v375_v47 }
 0x27f   :  { %v844_v49 = vpop.f32.mrf.mxu0 }
 0x280   :  { %v381_v50 = vpack.c.bf16 %v376_v48, %v376_v48 }
 0x281   :  { %v378_v51 = vpop.f32.mrf.mxu0 }
 0x282   :  { %855 = vmatmul.mubr.msk.bf16.vlgmr.msra.gmra.mxu1 %vm421_vm2, %v381_v50 }
 0x283   :  { %v845_v52 = vpop.f32.mrf.mxu0  ;;  %894 = vmatprep.mubr.msk.bf16.mxu1 %vm1036_vm0, %v1035_v0  ;;  %879 = vmatpush3.bf16.msra.mxu1 %v936_v55 }
 0x284   :  { %880 = vmatprep.subr.bf16.mxu1 %v1035_v0 }
 0x287   :  { %881 = vmatpush3.bf16.msra.mxu1 %v937_v56 }
 0x288   :  { %882 = vmatprep.subr.bf16.mxu1 %v1035_v0 }
 0x28b   :  { %883 = vmatpush3.bf16.msra.mxu1 %v938_v57 }
 0x28c   :  { %884 = vmatprep.subr.bf16.mxu1 %v1035_v0 }
 0x28f   :  { %885 = vmatpush3.bf16.msra.mxu1 %v939_v58 }
 0x290   :  { %886 = vmatprep.subr.bf16.mxu1 %v1035_v0 }
 0x293   :  { %887 = vmatpush3.bf16.msra.mxu1 %v940_v59 }
 0x294   :  { %888 = vmatprep.subr.bf16.mxu1 %v1035_v0 }
 0x297   :  { %889 = vmatpush3.bf16.msra.mxu1 %v941_v60 }
 0x298   :  { %890 = vmatprep.subr.bf16.mxu1 %v1035_v0 }
 0x29b   :  { %891 = vmatpush3.bf16.msra.mxu1 %v942_v6 }
 0x29c   :  { %892 = vmatprep.subr.bf16.mxu1 %v1035_v0 }
 0x29f   :  { %893 = vmatpush3.bf16.msra.mxu1 %v943_v7 }
 0x342   :  { %v459_v62 = vpop.f32.mrf.mxu1 }
 0x343   :  { %v460_v63 = vadd.f32 %v730_v61, %v459_v62 }
 0x344   :  { %v856_v1 = vpop.f32.mrf.mxu1 }
 0x345   :  { %v465_v2 = vmax.f32 %v460_v63, 0.0 }
 0x346   :  { %v462_v3 = vpop.f32.mrf.mxu1 }
 0x347   :  { %v466_v4 = vpack.c.bf16 %v465_v2, %v465_v2 }
 0x348   :  { %v857_v5 = vpop.f32.mrf.mxu1 }
 0x349   :  { %875 = vmatmul.mubr.bf16.vlgmr.msra.gmra.mxu0 %v466_v4 }
 0x409   :  { %v572_v9 = vpop.f32.mrf.mxu0 }
 0x40a   :  { %v573_v10 = vadd.f32 %v736_v8, %v572_v9 }
 0x40b   :  { %v876_v11 = vpop.f32.mrf.mxu0 }
 0x40c   :  { %v578_v12 = vmax.f32 %v573_v10, 0.0 }
 0x40d   :  { %v575_v13 = vpop.f32.mrf.mxu0 }
 0x40e   :  { %v579_v14 = vpack.c.bf16 %v578_v12, %v578_v12 }
 0x40f   :  { %v877_v15 = vpop.f32.mrf.mxu0 }
 0x410   :  { %895 = vmatmul.mubr.bf16.vlgmr.msra.gmra.mxu1 %v579_v14 }
 0x4d0   :  { %v685_v0 = vpop.f32.mrf.mxu1 }
 0x4d1   :  { %v686_v17 = vadd.f32 %v745_v16, %v685_v0 }
 0x4d2   :  { %v896_v18 = vpop.f32.mrf.mxu1 }
 0x4d3   :  { %691 = vst [vmem:[#allocation8] sm:$0xff] %v686_v17 }
 0x4d4   :  { %v688_v19 = vpop.f32.mrf.mxu1 }
 0x4d5   :  { %1015 = shalt.err (!%p1012_p5)
}
 0x4d6   :  { %701 = dma.vmem_to_hbm [thread:$0]  %s699_s27, 128, %s1264_s13, [#allocation4]   ;;  %v897_v20 = vpop.f32.mrf.mxu1 }
 0x4d7   :  { %1028 = dma.done.wait [#allocation4], 128  }
 0x4d8   :  { %1029 = vsyncadd [#allocation4], 4294967168 }
 0x4d9   :  { %705 = vsyncpa [#allocation3], 1 }
 0x4da   :  { %706 = vsyncpa [#allocation6], 1 }
 0x4db   :  { %707 = vsyncpa [#allocation4], 1 }

</bundles_post_ra>
